<compile_context>
chip_gen: v5e
topology: v5e:2x2
jax: 0.10.0
libtpu: 0.0.40
codegen_flags: <defaults>
</compile_context>

<pallas_src>
import math
from functools import lru_cache, partial

import jax
import jax.numpy as jnp
from jax import lax
from jax.experimental import pallas as pl
from jax.experimental.pallas import tpu as pltpu

_VMEM_LIMIT = 48 * 1024 * 1024   # explicit scoped-VMEM cap; < 64 MiB so it is valid on v7x too


def _round_up(n, m):
    return -(-n // m) * m


# --------------------------------------------------------------------------------------
# pltpu.roll direction self-check (cheap, run once).  pltpu.roll is documented to follow
# np.roll (out[i] = in[i - shift]); verify on the actual backend so the RoPE shift/mask
# pairing below is provably correct.
# --------------------------------------------------------------------------------------
@lru_cache(maxsize=None)
def _pltpu_roll_like_numpy() -> bool:
    def kernel(x_ref, o_ref):
        o_ref[...] = pltpu.roll(x_ref[...], 1, 1)

    x = jnp.broadcast_to(jnp.arange(128, dtype=jnp.float32), (8, 128))
    out = pl.pallas_call(kernel, out_shape=jax.ShapeDtypeStruct((8, 128), jnp.float32))(x)
    return bool(out[0, 0] == 127.0)


def _rope_shifts(dim, rot):
    # shift_m: rolled lane i holds t[i + rot]   (pairs with the -sin mask, lanes [0, rot))
    # shift_p: rolled lane i holds t[i - rot]   (pairs with the +sin mask, lanes [rot, 2*rot))
    return (dim - rot, rot) if _pltpu_roll_like_numpy() else (rot, dim - rot)


# --------------------------------------------------------------------------------------
# Kernel 1: LayerNorm + QKV projection + RoPE (scale folded into q)
# --------------------------------------------------------------------------------------
def qkv_rope_kernel(x_ref, lnw_ref, lnb_ref, wqkv_ref, cosw_ref, sina_ref, sinb_ref,
                    qkv_ref, *, dim, n_heads, scale, shift_m, shift_p):
    x = x_ref[...]                                            # (tq, D) f32
    mu = jnp.mean(x, axis=-1, keepdims=True)
    var = jnp.mean((x - mu) ** 2, axis=-1, keepdims=True)
    h = (x - mu) * lax.rsqrt(var + 1e-5) * lnw_ref[...] + lnb_ref[...]

    qkv = jnp.dot(h.astype(jnp.bfloat16), wqkv_ref[...],
                  preferred_element_type=jnp.float32)         # (tq, 3D) f32 accum

    # Per-head tables ((tq, hd) bf16) -> replicate across heads on the lane axis in-kernel.
    tile = lambda t: jnp.concatenate([t.astype(jnp.float32)] * n_heads, axis=-1)
    cos_w = tile(cosw_ref[...])                               # [cos, cos, 1...]  per head
    sin_a = tile(sina_ref[...])                               # [-sin, 0, 0...]   per head
    sin_b = tile(sinb_ref[...])                               # [0, +sin, 0...]   per head

    def rope(t):                                              # (tq, D); rotate first 2*rot lanes/head
        ax = t.ndim - 1
        return (t * cos_w
                + pltpu.roll(t, shift_m, ax) * sin_a          # lane i picks up t[i + rot]
                + pltpu.roll(t, shift_p, ax) * sin_b)         # lane i picks up t[i - rot]

    q = rope(qkv[:, :dim]) * scale                            # fold 1/sqrt(head_dim) into q
    k = rope(qkv[:, dim:2 * dim])
    qkv_ref[:, :dim] = q.astype(qkv_ref.dtype)
    qkv_ref[:, dim:2 * dim] = k.astype(qkv_ref.dtype)
    qkv_ref[:, 2 * dim:] = qkv[:, 2 * dim:].astype(qkv_ref.dtype)


# --------------------------------------------------------------------------------------
# Kernel 2: flash attention (resident K/V, in-kernel causal KV loop) + fused out_proj
# --------------------------------------------------------------------------------------
def attn_out_proj_kernel(q_ref, k_ref, v_ref, wo_ref, o_ref, m_sc, l_sc, acc_sc,
                         *, n_heads, head_dim, tq, tk):
    qi = pl.program_id(1)
    row0 = qi * tq
    # Row iota depends only on qi: hoisted out of both the head loop and the KV loop.
    row_ids = row0 + lax.broadcasted_iota(jnp.int32, (tq, 1), 0)
    # Causal bound: only KV tiles whose first column is <= the last row of this q tile.
    num_kv = (row0 + tq + tk - 1) // tk

    o_ref[...] = jnp.zeros(o_ref.shape, o_ref.dtype)          # f32 accumulator over heads

    for h in range(n_heads):                                  # static unroll over heads
        lo, hi = h * head_dim, (h + 1) * head_dim
        q = q_ref[:, lo:hi]                                   # (tq, hd) bf16, pre-scaled
        m_sc[...] = jnp.full(m_sc.shape, -jnp.inf, m_sc.dtype)
        l_sc[...] = jnp.zeros(l_sc.shape, l_sc.dtype)
        acc_sc[...] = jnp.zeros(acc_sc.shape, acc_sc.dtype)

        @pl.loop(0, num_kv)
        def _(ki):
            col0 = pl.multiple_of(ki * tk, tk)
            k_t = k_ref[pl.ds(col0, tk), lo:hi]               # (tk, hd) bf16 (VMEM-resident K)
            v_t = v_ref[pl.ds(col0, tk), lo:hi]               # (tk, hd) bf16 (VMEM-resident V)
            s = lax.dot_general(q, k_t, (((1,), (1,)), ((), ())),
                                preferred_element_type=jnp.float32)   # (tq, tk)

            def update(s_val):
                m_prev = m_sc[...]
                m_new = jnp.maximum(m_prev, jnp.max(s_val, axis=-1, keepdims=True))
                alpha = jnp.exp(m_prev - m_new)
                p = jnp.exp(s_val - m_new)
                l_sc[...] = alpha * l_sc[...] + jnp.sum(p, axis=-1, keepdims=True)
                acc_sc[...] = alpha * acc_sc[...] + jnp.dot(
                    p.astype(v_t.dtype), v_t, preferred_element_type=jnp.float32)
                m_sc[...] = m_new

            # Mask only on tiles that intersect the diagonal; tiles strictly below it skip
            # the iota/compare/select work entirely.
            intersects_diag = col0 + (tk - 1) > row0

            @pl.when(intersects_diag)
            def _():
                col_ids = col0 + lax.broadcasted_iota(jnp.int32, (1, tk), 1)
                update(jnp.where(col_ids <= row_ids, s, -1e30))

            @pl.when(jnp.logical_not(intersects_diag))
            def _():
                update(s)

        # Finalize this head and fold the output projection in (head acts as a reduction
        # axis of out_proj): o += softmax(qk)v @ Wo[h*hd:(h+1)*hd, :].
        # approx reciprocal ~1e-3 rel err; acceptable for this bf16/bf16 pipeline.
        inv_l = pl.reciprocal(l_sc[...], approx=True)
        attn_h = (acc_sc[...] * inv_l).astype(jnp.bfloat16)   # (tq, hd)
        o_ref[...] += jnp.dot(attn_h, wo_ref[lo:hi, :], preferred_element_type=jnp.float32)


# --------------------------------------------------------------------------------------
# pallas_call wrappers
# --------------------------------------------------------------------------------------
def _const_spec(shape):
    # Constant block index -> DMA'd once and kept resident across the whole grid.
    return pl.BlockSpec(shape, lambda *args: (0,) * len(shape))


def qkv_rope(x, lnw, lnb, wqkv_bf, cos_h, sina_h, sinb_h, *, n_heads, head_dim, rot, tq):
    B, S_pad, D = x.shape
    scale = 1.0 / math.sqrt(head_dim)
    shift_m, shift_p = _rope_shifts(D, rot)
    kernel = partial(qkv_rope_kernel, dim=D, n_heads=n_heads, scale=scale,
                     shift_m=shift_m, shift_p=shift_p)
    x_spec = pl.BlockSpec((None, tq, D), lambda b, i: (b, i, 0))
    tbl_spec = pl.BlockSpec((None, tq, head_dim), lambda b, i: (b, i, 0))
    return pl.pallas_call(
        kernel,
        out_shape=jax.ShapeDtypeStruct((B, S_pad, 3 * D), jnp.bfloat16),
        grid=(B, S_pad // tq),
        in_specs=[
            x_spec,
            _const_spec(lnw.shape),
            _const_spec(lnb.shape),
            _const_spec(wqkv_bf.shape),
            tbl_spec,                    # per-head cos   (bf16)
            tbl_spec,                    # per-head -sin  (bf16)
            tbl_spec,                    # per-head +sin  (bf16)
        ],
        out_specs=pl.BlockSpec((None, tq, 3 * D), lambda b, i: (b, i, 0)),
        compiler_params=pltpu.CompilerParams(
            dimension_semantics=("parallel", "parallel"),
            vmem_limit_bytes=_VMEM_LIMIT),
    )(x, lnw, lnb, wqkv_bf, cos_h, sina_h, sinb_h)


def attention_out_proj(qkv, wo_bf, *, n_heads, head_dim, tq, tk):
    B, S_pad, three_d = qkv.shape
    D = three_d // 3
    kernel = partial(attn_out_proj_kernel, n_heads=n_heads, head_dim=head_dim, tq=tq, tk=tk)
    return pl.pallas_call(
        kernel,
        out_shape=jax.ShapeDtypeStruct((B, S_pad, D), jnp.float32),
        grid=(B, S_pad // tq),
        in_specs=[
            # Q rows of the packed qkv (changes with the q-tile axis).
            pl.BlockSpec((None, tq, D), lambda b, i: (b, i, 0)),
            # K and V: full-sequence blocks whose index depends only on b -> fetched once per
            # batch and kept resident in VMEM across all q tiles (no per-tile re-streaming).
            pl.BlockSpec((None, S_pad, D), lambda b, i: (b, 0, 1)),
            pl.BlockSpec((None, S_pad, D), lambda b, i: (b, 0, 2)),
            # Wo: resident for the whole grid.
            pl.BlockSpec((D, D), lambda b, i: (0, 0)),
        ],
        out_specs=pl.BlockSpec((None, tq, D), lambda b, i: (b, i, 0)),
        scratch_shapes=[
            pltpu.VMEM((tq, 1), jnp.float32),           # running max
            pltpu.VMEM((tq, 1), jnp.float32),           # running denom
            pltpu.VMEM((tq, head_dim), jnp.float32),    # per-head accumulator
        ],
        compiler_params=pltpu.CompilerParams(
            # Both axes parallel: B * (S_pad // tq) >= 2, so v7x's 2 TensorCores both get work.
            dimension_semantics=("parallel", "parallel"),
            vmem_limit_bytes=_VMEM_LIMIT),
    )(qkv, qkv, qkv, wo_bf)


# --------------------------------------------------------------------------------------
# Rotary table construction + glue
# --------------------------------------------------------------------------------------
def make_theta(head_dim):
    # Matches SelfAttention.__init__: axial rotary table for a 32x32 grid + 1 class token.
    log_min = math.log(math.pi)
    log_max = math.log(10 * math.pi)
    freqs = jnp.exp(jnp.linspace(log_min, log_max, head_dim // 8 + 1))[:-1]
    h_pos = jnp.linspace(-1.0, 1.0, 33)
    h_pos = (h_pos[:-1] + h_pos[1:]) / 2
    hh, ww = jnp.meshgrid(h_pos, h_pos, indexing="ij")
    pos = jnp.stack([hh, ww], axis=-1).reshape(32 * 32, 2)
    pos = jnp.concatenate([jnp.zeros((1, 2)), pos], axis=0)          # (1025, 2)
    theta_h = pos[:, 0:1] * freqs
    theta_w = pos[:, 1:2] * freqs
    return jnp.concatenate([theta_h, theta_w], axis=-1)              # (1025, head_dim//4)


def _rope_tables(theta, pos, head_dim):
    # Per-head-width (B, S, head_dim) bf16 tables (deduped across heads; replicated in-kernel).
    rot = theta.shape[-1]
    th = jnp.take(theta, pos, axis=0).astype(jnp.float32)            # (B, S, rot)
    cos, sin = jnp.cos(th), jnp.sin(th)
    B, S, _ = th.shape
    rest = head_dim - 2 * rot
    ones_r = jnp.ones((B, S, rest), jnp.float32)
    zeros_r = jnp.zeros((B, S, rest), jnp.float32)
    zeros_rot = jnp.zeros_like(cos)
    cos_h = jnp.concatenate([cos, cos, ones_r], axis=-1)             # (B, S, hd)
    sina_h = jnp.concatenate([-sin, zeros_rot, zeros_r], axis=-1)
    sinb_h = jnp.concatenate([zeros_rot, sin, zeros_r], axis=-1)
    bf = lambda a: a.astype(jnp.bfloat16)
    return bf(cos_h), bf(sina_h), bf(sinb_h)


def init_params(key, dim, head_dim):
    # NOTE: the PyTorch module zero-inits out_proj; small random weights are used instead so
    # every compute path (incl. the fused out_proj) is exercised — the forward math is unchanged.
    theta = make_theta(head_dim)
    k0, k1 = jax.random.split(key)
    return {
        "dim": dim,
        "n_heads": dim // head_dim,
        "head_dim": head_dim,
        "rot_dim": theta.shape[-1],
        "theta": theta.astype(jnp.float32),
        "ln_w": jnp.ones((1, dim), jnp.float32),
        "ln_b": jnp.zeros((1, dim), jnp.float32),
        "wqkv": 0.02 * jax.random.normal(k0, (dim, 3 * dim), jnp.float32),
        "wo": 0.02 * jax.random.normal(k1, (dim, dim), jnp.float32),
    }


def self_attention_forward(params, x, pos, *, tq=None, tk=None):
    p = params
    B, S, D = x.shape
    H, hd, rot = p["n_heads"], p["head_dim"], p["rot_dim"]

    # Tile defaults (perf review): tq = tk = 256 keeps the 256-wide MXU on v6e/v7x fed and
    # amortizes per-grid-step overhead; on v5e (4x128^2 MXU, 1 store slot) 128-256 also works.
    if tq is None:
        tq = min(256, _round_up(S, 128))
    if tk is None:
        tk = min(256, _round_up(S, 128))
    assert tq % 8 == 0 and tk % 8 == 0

    # The real module runs S = 1025 (32*32 grid + class token): pad S up to a tile multiple.
    # End-padding is safe: the causal col<=row mask already excludes the trailing pad keys for
    # every real query row, and padded query rows are sliced off below.
    S_pad = _round_up(S, math.lcm(tq, tk))
    if S_pad != S:
        x = jnp.pad(x, ((0, 0), (0, S_pad - S), (0, 0)))
        pos = jnp.pad(pos, ((0, 0), (0, S_pad - S)))

    cos_h, sina_h, sinb_h = _rope_tables(p["theta"], pos, hd)
    wqkv_bf = p["wqkv"].astype(jnp.bfloat16)
    wo_bf = p["wo"].astype(jnp.bfloat16)

    qkv = qkv_rope(x, p["ln_w"], p["ln_b"], wqkv_bf, cos_h, sina_h, sinb_h,
                   n_heads=H, head_dim=hd, rot=rot, tq=tq)
    out = attention_out_proj(qkv, wo_bf, n_heads=H, head_dim=hd, tq=tq, tk=tk)
    return out[:, :S] if S_pad != S else out


# --------------------------------------------------------------------------------------
# Pure-JAX reference (f32) for correctness checking
# --------------------------------------------------------------------------------------
def reference_forward(params, x, pos):
    p = params
    D, H, hd, rot = p["dim"], p["n_heads"], p["head_dim"], p["rot_dim"]
    B, S, _ = x.shape
    theta_g = jnp.take(p["theta"], pos, axis=0)
    cos = jnp.cos(theta_g)[:, :, None, :]
    sin = jnp.sin(theta_g)[:, :, None, :]

    mu = x.mean(-1, keepdims=True)
    var = ((x - mu) ** 2).mean(-1, keepdims=True)
    h = (x - mu) / jnp.sqrt(var + 1e-5) * p["ln_w"][0] + p["ln_b"][0]

    qkv = h @ p["wqkv"]

    def rope(t):
        t1, t2, rest = t[..., :rot], t[..., rot:2 * rot], t[..., 2 * rot:]
        return jnp.concatenate([t1 * cos - t2 * sin, t2 * cos + t1 * sin, rest], axis=-1)

    q = rope(qkv[..., :D].reshape(B, S, H, hd))
    k = rope(qkv[..., D:2 * D].reshape(B, S, H, hd))
    v = qkv[..., 2 * D:].reshape(B, S, H, hd)

    s = jnp.einsum("bqhd,bkhd->bhqk", q, k) / math.sqrt(hd)
    mask = jnp.tril(jnp.ones((S, S), bool))
    s = jnp.where(mask, s, -jnp.inf)
    a = jax.nn.softmax(s, axis=-1)
    o = jnp.einsum("bhqk,bkhd->bqhd", a, v).reshape(B, S, D)
    return o @ p["wo"]


# --------------------------------------------------------------------------------------
if __name__ == "__main__":
    # Small but TPU-lane-friendly shapes; S = 200 deliberately does not divide the tiles so
    # the sequence-padding path (needed for the module's real S = 1025) is exercised.
    B, S = 2, 200
    dim, head_dim = 256, 128

    key = jax.random.PRNGKey(0)
    k_params, k_x = jax.random.split(key)
    params = init_params(k_params, dim, head_dim)

    x = jax.random.normal(k_x, (B, S, dim), jnp.float32)
    pos = jnp.broadcast_to(jnp.arange(S, dtype=jnp.int32), (B, S))   # rotary table indices

    ref = jax.block_until_ready(reference_forward(params, x, pos))

    # Run 1: default tiles (tq = tk = 256) -> single-tile flash path + padding 200 -> 256.
    out = jax.block_until_ready(self_attention_forward(params, x, pos))
    assert out.shape == (B, S, dim), out.shape
    err = float(jnp.max(jnp.abs(out - ref)))
    assert jnp.allclose(out, ref, rtol=5e-2, atol=5e-3), err

    # Run 2: smaller tiles (correctness coverage, not a perf config) -> multi-tile KV loop,
    # causal tile skip, and both the masked and unmasked flash branches.
    out2 = jax.block_until_ready(self_attention_forward(params, x, pos, tq=128, tk=128))
    err2 = float(jnp.max(jnp.abs(out2 - ref)))
    assert jnp.allclose(out2, ref, rtol=5e-2, atol=5e-3), err2

    print("KERNEL_OK")
</pallas_src>

<mosaic_0001>
module attributes {stable_mosaic.version = 11 : i64} {
  func.func @kernel(%arg0: memref<8x128xf32, #tpu.memory_space<vmem>>, %arg1: memref<8x128xf32, #tpu.memory_space<vmem>>) attributes {dimension_semantics = [], scalar_prefetch = 0 : i64, scratch_operands = 0 : i64, tpu.core_type = #tpu.core_type<tc>} {
    %c0 = arith.constant 0 : index
    %c0_0 = arith.constant 0 : index
    %0 = vector.load %arg0[%c0, %c0_0] : memref<8x128xf32, #tpu.memory_space<vmem>>, vector<8x128xf32>
    %c1_i32 = arith.constant 1 : i32
    %1 = tpu.dynamic_rotate %0 by %c1_i32 dim 1 : vector<8x128xf32>, i32 -> vector<8x128xf32>
    %c0_1 = arith.constant 0 : index
    %c0_2 = arith.constant 0 : index
    %2 = vector.load %arg1[%c0_1, %c0_2] : memref<8x128xf32, #tpu.memory_space<vmem>>, vector<8x128xf32>
    tpu.vector_store %arg1[%c0_1, %c0_2], %1 {strides = array<i32>} : memref<8x128xf32, #tpu.memory_space<vmem>>, vector<8x128xf32>,
    return
  }
}

</mosaic_0001>

<bundles_post_ra>
// kernel: tpu_custom_call.1
= control target key start
LH: loop header
LB: loop body
LE: loop exit
PB: predicated region body
PF: predicated region fallthrough
CT: control target
= control target key end

     0   :  { %6 = vsyncpa [#allocation3], 0  ;;  %s118_s0 = inlined_call_operand.hbm [shape: f32[8,128], index: 0, kind: input, shape index: {}]   ;;  %s119_s1 = inlined_call_operand.hbm [shape: f32[8,128], index: 1, kind: output, shape index: {}]  }
   0x1   :  { %7 = vsyncpa [#allocation4], 0  ;;  %s13_s8 = sshll.u32 %s118_s0, 4  ;;  %s99_s9 = smov [#allocation2]   ;;  %s14_s8 = int_to_ptr.hbm [resolvable:$true] %s13_s8 }
   0x2   :  { %s15_s10 = sshll.u32 %s99_s9, 4  ;;  %s16_s10 = int_to_ptr.vmem [resolvable:$true] %s15_s10 }
   0x3   :  { %18 = dma.hbm_to_vmem [thread:$0]  %s14_s8, 128, %s16_s10, [#allocation3]  }
   0x4   :  { %95 = dma.done.wait [#allocation3], 128  }
   0x5   :  { %96 = vsyncadd [#allocation3], 4294967168  ;;  %v23_v0 = vld [vmem:[#allocation2] sm:$0xff]  ;;  %s100_s11 = smov 1   ;;  %s101_s12 = smov [#allocation5]  }
   0x6   :  { %24 = vrot.lane.b32.xlu0 %v23_v0, %s100_s11  ;;  %s32_s13 = sshll.u32 %s101_s12, 4  ;;  %s34_s16 = sshll.u32 %s119_s1, 4  ;;  %s33_s13 = int_to_ptr.vmem [resolvable:$true] %s32_s13  ;;  %s35_s16 = int_to_ptr.hbm [resolvable:$true] %s34_s16 }
  0x78   :  { %v25_v1 = vpop.permute.xlu0 %24 }
  0x79   :  { %26 = vst [vmem:[#allocation5] sm:$0xff] %v25_v1 }
  0x7a   :  { %37 = dma.vmem_to_hbm [thread:$0]  %s33_s13, 128, %s35_s16, [#allocation4]  }
  0x7b   :  { %97 = dma.done.wait [#allocation4], 128  }
  0x7c   :  { %98 = vsyncadd [#allocation4], 4294967168 }
  0x7d   :  { %42 = vsyncpa [#allocation3], 1 }
  0x7e   :  { %43 = vsyncpa [#allocation4], 1 }

</bundles_post_ra>
